<compile_context>
chip_gen: v6e
topology: v6e:2x2x1
jax: 0.10.0
libtpu: 0.0.40
codegen_flags: <defaults>
</compile_context>

<pallas_src>
import jax
import jax.numpy as jnp
from jax.experimental import pallas as pl
from jax.experimental.pallas import tpu as pltpu


def _round_up(x, m):
    return ((x + m - 1) // m) * m


def _make_ncf_mlp_kernel(n_fields, n_hidden):
    """Fused NCF-MLP kernel; activations are [features, batch] (batch on lanes)."""

    def kernel(idx_ref, wf_ref, b0_ref, *refs):
        hidden_refs = refs[: 2 * (n_hidden - 1)]
        w_last_ref, b_last_ref, o_ref = refs[2 * (n_hidden - 1):]

        tile_b = idx_ref.shape[1]
        sum_vocab = wf_ref.shape[1]
        ids = idx_ref[...]                                   # (n_fields, tile_b) int32

        # Combined one-hot over the concatenated (offset) vocabulary.  Field
        # vocab ranges are disjoint, so OR-ing the per-field compares yields
        # exactly the stacked one-hot.  (Two-step cast keeps the bool->bf16
        # convert on well-supported paths; the intermediate is only
        # (sum_vocab, tile_b) and 0/1 is exact in bf16.)
        iota = jax.lax.broadcasted_iota(jnp.int32, (sum_vocab, tile_b), 0)
        hit = iota == ids[0:1, :]
        for f in range(1, n_fields):
            hit = jnp.logical_or(hit, iota == ids[f:f + 1, :])
        onehot = hit.astype(jnp.float32).astype(wf_ref.dtype)

        # Folded gather + concat + first Linear:  h0 = Wf @ onehot + b0, ReLU.
        h = jnp.dot(wf_ref[...], onehot, preferred_element_type=jnp.float32)
        h = jnp.maximum(h + b0_ref[...], 0.0)                # (d0, tile_b) f32

        # Remaining hidden Linear+ReLU layers (PyTorch [out, in] weight layout).
        for i in range(n_hidden - 1):
            w_ref = hidden_refs[2 * i]
            b_ref = hidden_refs[2 * i + 1]
            h = jnp.dot(w_ref[...], h.astype(w_ref.dtype),
                        preferred_element_type=jnp.float32)
            h = jnp.maximum(h + b_ref[...], 0.0)

        # Final Linear(->1): VPU multiply + XLU sublane reduce (no N=1 matmul),
        # sigmoid with the divide pushed onto the EUP reciprocal slot.
        z = jnp.sum(h * w_last_ref[...], axis=0, keepdims=True) + b_last_ref[0, 0]
        o_ref[...] = pl.reciprocal(1.0 + jnp.exp(-z), approx=True)   # (1, tile_b)

    return kernel


def ncf_mlp_forward(indices, emb_tables, weights, biases, *,
                    tile_b=None, use_bf16=True):
    """Fused NCF_MLP forward.

    indices:    list (one per embedding field) of int32 [B] id vectors.
    emb_tables: list of f32 [vocab_f, emb_dim] embedding tables.
    weights:    [W0, ..., W_{L-1}, W_last] in PyTorch nn.Linear layout [out, in].
    biases:     matching [out] bias vectors.
    use_bf16:   feed the MXU bf16 operands (f32 accumulate).  Recommended on
                v5e, v6e and v7x alike; all elementwise math stays f32.
    """
    n_fields = len(emb_tables)
    n_hidden = len(weights) - 1
    assert len(indices) == n_fields and len(biases) == len(weights)
    assert n_hidden >= 1, "expect at least one hidden Linear+ReLU layer"
    emb_dim = int(emb_tables[0].shape[1])
    vocabs = [int(t.shape[0]) for t in emb_tables]
    sum_vocab = sum(vocabs)
    # One-hot-matmul gather is only sensible for small vocabularies.
    # TODO(synk): for MovieLens-scale vocabs (~27k/138k), switch this path to a
    # scalar-prefetch / manual-DMA row-gather instead of the one-hot fold.
    assert sum_vocab <= 4096, "one-hot gather path assumes toy vocab sizes"

    B = int(indices[0].shape[0])
    if tile_b is None:
        # Big tiles amortize per-grid-step overhead; keep >=4 steps when B is
        # large enough so the 'parallel' axis shards across v7x's 2 TCs.
        tile_b = max(128, min(8192, _round_up(pl.cdiv(B, 4), 128)))
    tile_b = _round_up(tile_b, 128)
    B_pad = _round_up(B, tile_b)
    grid = (B_pad // tile_b,)

    mm_dtype = jnp.bfloat16 if use_bf16 else jnp.float32

    # Offset ids into the concatenated vocab; padded tail columns use id 0
    # (valid) and are sliced off after the kernel.
    offsets, off = [], 0
    for v in vocabs:
        offsets.append(off)
        off += v
    idx = jnp.stack(
        [indices[f].astype(jnp.int32) + offsets[f] for f in range(n_fields)],
        axis=0)                                                   # (n_fields, B)
    idx = jnp.pad(idx, ((0, 0), (0, B_pad - B)))

    # Fold gather + concat + first Linear:  Wf = [W0_f @ E_f^T]_f  (d0, sum_vocab)
    w0 = weights[0].astype(jnp.float32)
    wf = jnp.concatenate(
        [w0[:, f * emb_dim:(f + 1) * emb_dim] @ emb_tables[f].astype(jnp.float32).T
         for f in range(n_fields)], axis=1).astype(mm_dtype)      # (d0, sum_vocab)
    b0 = biases[0].reshape(-1, 1).astype(jnp.float32)             # (d0, 1)

    hidden_params = []
    for w, b in zip(weights[1:-1], biases[1:-1]):
        hidden_params += [w.astype(mm_dtype), b.reshape(-1, 1).astype(jnp.float32)]

    w_last = weights[-1].reshape(-1, 1).astype(jnp.float32)       # (d_{L-1}, 1)
    b_last = biases[-1].reshape(1, 1).astype(jnp.float32)         # scalar -> SMEM

    def resident(a):
        zeros = (0,) * a.ndim
        return pl.BlockSpec(a.shape, lambda i: zeros)             # whole array, VMEM-resident

    in_specs = ([pl.BlockSpec((n_fields, tile_b), lambda i: (0, i)),   # ids per tile
                 resident(wf), resident(b0)]
                + [resident(p) for p in hidden_params]
                + [resident(w_last),
                   pl.BlockSpec(memory_space=pltpu.MemorySpace.SMEM)])  # b_last scalar

    out = pl.pallas_call(
        _make_ncf_mlp_kernel(n_fields, n_hidden),
        out_shape=jax.ShapeDtypeStruct((1, B_pad), jnp.float32),
        grid=grid,
        in_specs=in_specs,
        out_specs=pl.BlockSpec((1, tile_b), lambda i: (0, i)),    # lane-dense store
        compiler_params=pltpu.CompilerParams(
            dimension_semantics=("parallel",),
            vmem_limit_bytes=32 * 1024 * 1024),
    )(idx, wf, b0, *hidden_params, w_last, b_last)

    return out[0, :B].reshape(B, 1)


def _reference(indices, emb_tables, weights, biases):
    embs = [jnp.take(t, i, axis=0) for t, i in zip(emb_tables, indices)]
    h = jnp.concatenate(embs, axis=1)
    for w, b in zip(weights[:-1], biases[:-1]):
        h = jnp.maximum(h @ w.T + b, 0.0)
    z = h @ weights[-1].T + biases[-1]
    return 1.0 / (1.0 + jnp.exp(-z))


if __name__ == "__main__":
    # Small config consistent with the module:
    #   emb_size=[16, 24], emb_dim=32, mlp_dims=[64, 32], batch=8
    emb_size = [16, 24]
    emb_dim = 32
    mlp_dims = [64, 32]
    batch = 8
    in_dim = len(emb_size) * emb_dim  # 64

    key = jax.random.PRNGKey(0)
    keys = jax.random.split(key, 16)
    ki = iter(keys)

    emb_tables = [
        0.1 * jax.random.normal(next(ki), (size, emb_dim), dtype=jnp.float32)
        for size in emb_size
    ]
    dims = [in_dim] + mlp_dims + [1]
    weights, biases = [], []
    for d_in, d_out in zip(dims[:-1], dims[1:]):
        # PyTorch nn.Linear layout: weight [out, in], bias [out].
        weights.append(
            jax.random.normal(next(ki), (d_out, d_in), dtype=jnp.float32)
            / jnp.sqrt(jnp.float32(d_in)))
        biases.append(
            0.01 * jax.random.normal(next(ki), (d_out,), dtype=jnp.float32))

    # Inputs: one int index vector per embedding field (x = [user_ids, item_ids]).
    indices = [
        jax.random.randint(next(ki), (batch,), 0, size, dtype=jnp.int32)
        for size in emb_size
    ]

    ref = _reference(indices, emb_tables, weights, biases)

    # Default path: bf16 MXU operands (recommended on all generations).
    out = jax.block_until_ready(ncf_mlp_forward(indices, emb_tables, weights, biases))
    assert out.shape == (batch, 1)
    assert jnp.allclose(out, ref, atol=3e-2, rtol=3e-2)

    # f32 MXU-operand path (near-exact; only the approx-reciprocal sigmoid differs).
    out_f32 = jax.block_until_ready(
        ncf_mlp_forward(indices, emb_tables, weights, biases, use_bf16=False))
    assert jnp.allclose(out_f32, ref, atol=5e-3, rtol=5e-3)

    # Multi-tile grid + tail-padding path.
    batch2 = 300
    indices2 = [
        jax.random.randint(next(ki), (batch2,), 0, size, dtype=jnp.int32)
        for size in emb_size
    ]
    ref2 = _reference(indices2, emb_tables, weights, biases)
    out2 = jax.block_until_ready(ncf_mlp_forward(indices2, emb_tables, weights, biases))
    assert out2.shape == (batch2, 1)
    assert jnp.allclose(out2, ref2, atol=3e-2, rtol=3e-2)

    print("KERNEL_OK")
</pallas_src>

<mosaic_0001>
module attributes {stable_mosaic.version = 11 : i64} {
  func.func @kernel(%arg0: i32, %arg1: memref<2x128xi32, #tpu.memory_space<vmem>>, %arg2: memref<64x40xbf16, #tpu.memory_space<vmem>>, %arg3: memref<64x1xf32, #tpu.memory_space<vmem>>, %arg4: memref<32x64xbf16, #tpu.memory_space<vmem>>, %arg5: memref<32x1xf32, #tpu.memory_space<vmem>>, %arg6: memref<32x1xf32, #tpu.memory_space<vmem>>, %arg7: memref<1x1xf32, #tpu.memory_space<smem>>, %arg8: memref<1x128xf32, #tpu.memory_space<vmem>>) attributes {dimension_semantics = [#tpu.dimension_semantics<parallel>], iteration_bounds = array<i64: 1>, scalar_prefetch = 0 : i64, scratch_operands = 0 : i64, tpu.core_type = #tpu.core_type<tc>, window_params = [{transform_indices = @transform_0, window_bounds = array<i64: 2, 128>}, {pipeline_mode = #tpu.pipeline_mode<synchronous>, transform_indices = @transform_1, window_bounds = array<i64: 64, 40>}, {pipeline_mode = #tpu.pipeline_mode<synchronous>, transform_indices = @transform_2, window_bounds = array<i64: 64, 1>}, {pipeline_mode = #tpu.pipeline_mode<synchronous>, transform_indices = @transform_3, window_bounds = array<i64: 32, 64>}, {pipeline_mode = #tpu.pipeline_mode<synchronous>, transform_indices = @transform_4, window_bounds = array<i64: 32, 1>}, {pipeline_mode = #tpu.pipeline_mode<synchronous>, transform_indices = @transform_5, window_bounds = array<i64: 32, 1>}, {transform_indices = @transform_6, window_bounds = array<i64: 1, 1>}, {transform_indices = @transform_7, window_bounds = array<i64: 1, 128>}]} {
    %c0 = arith.constant 0 : index
    %c0_0 = arith.constant 0 : index
    %0 = vector.load %arg1[%c0, %c0_0] : memref<2x128xi32, #tpu.memory_space<vmem>>, vector<2x128xi32>
    %1 = tpu.iota {dimensions = array<i32: 0>} : vector<40x128xi32>
    %2 = vector.extract_strided_slice %0 {offsets = [0, 0], sizes = [1, 128], strides = [1, 1]} : vector<2x128xi32> to vector<1x128xi32>
    %3 = vector.broadcast %2 : vector<1x128xi32> to vector<40x128xi32>
    %4 = arith.cmpi eq, %1, %3 : vector<40x128xi32>
    %5 = vector.extract_strided_slice %0 {offsets = [1, 0], sizes = [1, 128], strides = [1, 1]} : vector<2x128xi32> to vector<1x128xi32>
    %6 = vector.broadcast %5 : vector<1x128xi32> to vector<40x128xi32>
    %7 = arith.cmpi eq, %1, %6 : vector<40x128xi32>
    %8 = arith.ori %4, %7 : vector<40x128xi1>
    %9 = arith.extui %8 : vector<40x128xi1> to vector<40x128xi32>
    %10 = arith.sitofp %9 : vector<40x128xi32> to vector<40x128xf32>
    %11 = arith.truncf %10 : vector<40x128xf32> to vector<40x128xbf16>
    %c0_1 = arith.constant 0 : index
    %c0_2 = arith.constant 0 : index
    %12 = vector.load %arg2[%c0_1, %c0_2] : memref<64x40xbf16, #tpu.memory_space<vmem>>, vector<64x40xbf16>
    %cst = arith.constant dense<0.000000e+00> : vector<64x128xf32>
    %13 = tpu.matmul %12, %11, %cst {dimension_numbers = #tpu.dot_dimension_numbers<[1], [0], [0], [1], [0, 0, 1, 1], [], []>} : vector<64x40xbf16>, vector<40x128xbf16>, vector<64x128xf32> -> vector<64x128xf32>
    %c0_3 = arith.constant 0 : index
    %c0_4 = arith.constant 0 : index
    %14 = vector.load %arg3[%c0_3, %c0_4] : memref<64x1xf32, #tpu.memory_space<vmem>>, vector<64x1xf32>
    %15 = vector.broadcast %14 : vector<64x1xf32> to vector<64x128xf32>
    %16 = arith.addf %13, %15 : vector<64x128xf32>
    %cst_5 = arith.constant 0.000000e+00 : f32
    %17 = vector.broadcast %cst_5 : f32 to vector<64x128xf32>
    %18 = arith.maximumf %16, %17 : vector<64x128xf32>
    %c0_6 = arith.constant 0 : index
    %c0_7 = arith.constant 0 : index
    %19 = vector.load %arg4[%c0_6, %c0_7] : memref<32x64xbf16, #tpu.memory_space<vmem>>, vector<32x64xbf16>
    %20 = arith.truncf %18 : vector<64x128xf32> to vector<64x128xbf16>
    %cst_8 = arith.constant dense<0.000000e+00> : vector<32x128xf32>
    %21 = tpu.matmul %19, %20, %cst_8 {dimension_numbers = #tpu.dot_dimension_numbers<[1], [0], [0], [1], [0, 0, 1, 1], [], []>} : vector<32x64xbf16>, vector<64x128xbf16>, vector<32x128xf32> -> vector<32x128xf32>
    %c0_9 = arith.constant 0 : index
    %c0_10 = arith.constant 0 : index
    %22 = vector.load %arg5[%c0_9, %c0_10] : memref<32x1xf32, #tpu.memory_space<vmem>>, vector<32x1xf32>
    %23 = vector.broadcast %22 : vector<32x1xf32> to vector<32x128xf32>
    %24 = arith.addf %21, %23 : vector<32x128xf32>
    %cst_11 = arith.constant 0.000000e+00 : f32
    %25 = vector.broadcast %cst_11 : f32 to vector<32x128xf32>
    %26 = arith.maximumf %24, %25 : vector<32x128xf32>
    %c0_12 = arith.constant 0 : index
    %c0_13 = arith.constant 0 : index
    %27 = vector.load %arg6[%c0_12, %c0_13] : memref<32x1xf32, #tpu.memory_space<vmem>>, vector<32x1xf32>
    %28 = vector.broadcast %27 : vector<32x1xf32> to vector<32x128xf32>
    %29 = arith.mulf %26, %28 : vector<32x128xf32>
    %cst_14 = arith.constant dense<0.000000e+00> : vector<128xf32>
    %30 = vector.multi_reduction <add>, %29, %cst_14 [0] : vector<32x128xf32> to vector<128xf32>
    %31 = vector.shape_cast %30 : vector<128xf32> to vector<1x128xf32>
    %c0_15 = arith.constant 0 : index
    %c0_16 = arith.constant 0 : index
    %32 = memref.load %arg7[%c0_15, %c0_16] : memref<1x1xf32, #tpu.memory_space<smem>>
    %33 = vector.broadcast %32 : f32 to vector<1x128xf32>
    %34 = arith.addf %31, %33 : vector<1x128xf32>
    %cst_17 = arith.constant 0.000000e+00 : f32
    %35 = vector.broadcast %cst_17 : f32 to vector<1x128xf32>
    %36 = arith.subf %35, %34 : vector<1x128xf32>
    %37 = math.exp %36 : vector<1x128xf32>
    %cst_18 = arith.constant 1.000000e+00 : f32
    %38 = vector.broadcast %cst_18 : f32 to vector<1x128xf32>
    %39 = arith.addf %38, %37 : vector<1x128xf32>
    %40 = tpu.reciprocal %39 {approx = true} : vector<1x128xf32> -> vector<1x128xf32>
    %c0_19 = arith.constant 0 : index
    %c0_20 = arith.constant 0 : index
    %41 = vector.load %arg8[%c0_19, %c0_20] : memref<1x128xf32, #tpu.memory_space<vmem>>, vector<1x128xf32>
    tpu.vector_store %arg8[%c0_19, %c0_20], %40 {strides = array<i32>} : memref<1x128xf32, #tpu.memory_space<vmem>>, vector<1x128xf32>,
    return
  }
  func.func @transform_0(%arg0: i32) -> (i32, i32) {
    %c0_i32 = arith.constant 0 : i32
    %c0_i32_0 = arith.constant 0 : i32
    return %c0_i32, %arg0 : i32, i32
  }
  func.func @transform_1(%arg0: i32) -> (i32, i32) {
    %c0_i32 = arith.constant 0 : i32
    %c0_i32_0 = arith.constant 0 : i32
    %c0_i32_1 = arith.constant 0 : i32
    return %c0_i32, %c0_i32_0 : i32, i32
  }
  func.func @transform_2(%arg0: i32) -> (i32, i32) {
    %c0_i32 = arith.constant 0 : i32
    %c0_i32_0 = arith.constant 0 : i32
    %c0_i32_1 = arith.constant 0 : i32
    return %c0_i32, %c0_i32_0 : i32, i32
  }
  func.func @transform_3(%arg0: i32) -> (i32, i32) {
    %c0_i32 = arith.constant 0 : i32
    %c0_i32_0 = arith.constant 0 : i32
    %c0_i32_1 = arith.constant 0 : i32
    return %c0_i32, %c0_i32_0 : i32, i32
  }
  func.func @transform_4(%arg0: i32) -> (i32, i32) {
    %c0_i32 = arith.constant 0 : i32
    %c0_i32_0 = arith.constant 0 : i32
    %c0_i32_1 = arith.constant 0 : i32
    return %c0_i32, %c0_i32_0 : i32, i32
  }
  func.func @transform_5(%arg0: i32) -> (i32, i32) {
    %c0_i32 = arith.constant 0 : i32
    %c0_i32_0 = arith.constant 0 : i32
    %c0_i32_1 = arith.constant 0 : i32
    return %c0_i32, %c0_i32_0 : i32, i32
  }
  func.func @transform_6(%arg0: i32) -> (i32, i32) {
    %c0_i32 = arith.constant 0 : i32
    %c0_i32_0 = arith.constant 0 : i32
    %c0_i32_1 = arith.constant 0 : i32
    return %c0_i32, %c0_i32_0 : i32, i32
  }
  func.func @transform_7(%arg0: i32) -> (i32, i32) {
    %c0_i32 = arith.constant 0 : i32
    %c0_i32_0 = arith.constant 0 : i32
    return %c0_i32, %arg0 : i32, i32
  }
}

</mosaic_0001>

<bundles_post_ra>
// kernel: tpu_custom_call.1
= control target key start
LH: loop header
LB: loop body
LE: loop exit
PB: predicated region body
PF: predicated region fallthrough
CT: control target
= control target key end

     0   :  { %v30_v0 = vlaneseq  ;;  %vm148_vm0 = vcmask 326656   ;;  %v499_v8 = vmov 0   ;;  %v500_v17 = vmov 0.0   ;;  %s648_s0 = inlined_call_operand.vmem [shape: s32[2,128], index: 0, kind: input, shape index: {}]   ;;  %s649_s1 = inlined_call_operand.vmem [shape: bf16[64,40], index: 1, kind: input, shape index: {}]   ;;  %s650_s2 = inlined_call_operand.vmem [shape: f32[64,1], index: 2, kind: input, shape index: {}]   ;;  %s651_s3 = inlined_call_operand.vmem [shape: bf16[32,64], index: 3, kind: input, shape index: {}]   ;;  %s652_s4 = inlined_call_operand.vmem [shape: f32[32,1], index: 4, kind: input, shape index: {}]   ;;  %s653_s5 = inlined_call_operand.vmem [shape: f32[32,1], index: 5, kind: input, shape index: {}]   ;;  %s654_s6 = inlined_call_operand.<no memory space> [shape: f32[1,1], index: 6, kind: input, shape index: {}]   ;;  %s655_s7 = inlined_call_operand.hbm [shape: f32[1,128], index: 7, kind: output, shape index: {}]  }
   0x1   :  { %v29_v1 = vld [vmem:[%s648_s0] sm:$0x3]  ;;  %465 = vset.pattern.permute.xlu0 %v499_v8  ;;  %466 = vset.pattern.permute.xlu1 %v499_v8  ;;  %v86_v10 = vld [vmem:[%s650_s2 + $0x30] sm:$0xff]  ;;  %v87_v15 = vld [vmem:[%s650_s2 + $0x38] sm:$0xff]  ;;  %vm161_vm8 = vcmask 1043456  }
   0x2   :  { %v467_v2 = vld [vmem:[%s649_s1] sm:$0xff]   ;;  %v31_v3 = vshrl.u32 %v30_v0, 7  ;;  %120 = vperm.xlu0 %465, %v86_v10   ;;  %v85_v16 = vld [vmem:[%s650_s2 + $0x28] sm:$0xff]  ;;  %v82_v22 = vld [vmem:[%s650_s2 + $0x10] sm:$0xff]  ;;  %v501_v27 = vmov 1.0|1.0  }
   0x3   :  { %440 = vmatprep.mubr.msk.bf16.mxu0 %vm148_vm0, %v467_v2  ;;  %v84_v13 = vld [vmem:[%s650_s2 + $0x20] sm:$0xff]  ;;  %v83_v23 = vld [vmem:[%s650_s2 + $0x18] sm:$0xff]  ;;  %v81_v29 = vld [vmem:[%s650_s2 + $0x8] sm:$0xff] }
   0x4   :  { %v35_v4 = vadd.s32 32, %v31_v3  ;;  %v38_v5 = vsub.s32 0, %v31_v3  ;;  %v47_v6 = vsub.s32 1, %v31_v3  ;;  %v33_v7 = vadd.s32 16, %v31_v3  ;;  %110 = vperm.xlu1 %466, %v84_v13   ;;  %v80_v28 = vld [vmem:[%s650_s2] sm:$0xff] }
   0x5   :  { %v34_v9 = vadd.s32 24, %v31_v3  ;;  %v32_v14 = vadd.s32 8, %v31_v3 }
   0x6   :  { %v39_v11 = vrot.slane %v29_v1, %v38_v5  ;;  %v48_v12 = vrot.slane %v29_v1, %v47_v6  ;;  %125 = vperm.xlu0 %465, %v87_v15  }
   0x8   :  { %vm44_vm1 = vcmp.eq.s32.totalorder %v35_v4, %v39_v11  ;;  %vm53_vm2 = vcmp.eq.s32.totalorder %v35_v4, %v48_v12  ;;  %vm42_vm3 = vcmp.eq.s32.totalorder %v33_v7, %v39_v11  ;;  %vm43_vm4 = vcmp.eq.s32.totalorder %v34_v9, %v39_v11  ;;  %115 = vperm.xlu1 %466, %v85_v16  }
   0x9   :  { %vm58_vm5 = vmor %vm44_vm1, %vm53_vm2  ;;  %vm51_vm6 = vcmp.eq.s32.totalorder %v33_v7, %v48_v12  ;;  %vm52_vm7 = vcmp.eq.s32.totalorder %v34_v9, %v48_v12  ;;  %vm40_vm10 = vcmp.eq.s32.totalorder %v31_v3, %v39_v11  ;;  %vm49_vm11 = vcmp.eq.s32.totalorder %v31_v3, %v48_v12 }
   0xa   :  { %v404_v18 = vsel %vm58_vm5, 1.0, %v500_v17  ;;  %vm562_vm9 = vmor %vm42_vm3, %vm51_vm6  ;;  %vm41_vm13 = vcmp.eq.s32.totalorder %v32_v14, %v39_v11  ;;  %vm50_vm14 = vcmp.eq.s32.totalorder %v32_v14, %v48_v12  ;;  %100 = vperm.xlu0 %465, %v82_v22  }
   0xb   :  { %v71_v20 = vpack.c.bf16 %v404_v18, %v404_v18  ;;  %vm566_vm12 = vmor %vm43_vm4, %vm52_vm7 }
   0xc   :  { %vm409_vm15 = vmpackc.low %vm566_vm12, %vm562_vm9  ;;  %105 = vperm.xlu1 %466, %v83_v23  }
   0xd   :  { %460 = vmatprep.subr.msk.bf16.mxu0 %vm161_vm8, %v71_v20  ;;  %v163_v24 = vsel %vm161_vm8, %v71_v20, 0  ;;  %vm580_vm1 = vmor %vm40_vm10, %vm49_vm11 }
   0xe   :  { %435 = vmatpush3.bf16.msra.mxu0 %v163_v24  ;;  %vm584_vm2 = vmor %vm41_vm13, %vm50_vm14 }
   0xf   :  { %436 = vmatprep.subr.msk.bf16.mxu0 %vm409_vm15, %v501_v27  ;;  %vm411_vm3 = vmpackc.low %vm584_vm2, %vm580_vm1 }
  0x10   :  { %13 = vsyncpa [#allocation4], 0  ;;  %90 = vperm.xlu0 %465, %v80_v28   ;;  %95 = vperm.xlu1 %466, %v81_v29   ;;  %v246_v30 = vld [vmem:[%s652_s4] sm:$0xff]  ;;  %v247_v31 = vld [vmem:[%s652_s4 + $0x8] sm:$0xff]  ;;  %vm280_vm4 = vcmask 523264   ;;  %s502_s19 = smov [#allocation3]  }
  0x11   :  { %v468_v32 = vld [vmem:[%s649_s1 + $0x8] sm:$0xff]   ;;  %v469_v33 = vld [vmem:[%s649_s1 + $0x10] sm:$0xff]   ;;  %v249_v35 = vld [vmem:[%s652_s4 + $0x18] sm:$0xff]  ;;  %s392_s20 = sshll.u32 %s502_s19, 4  ;;  %s393_s20 = int_to_ptr.vmem [resolvable:$true] %s392_s20 }
  0x12   :  { %437 = vmatpush3.bf16.msk.msra.mxu0 %vm409_vm15, %v501_v27  ;;  %v248_v34 = vld [vmem:[%s652_s4 + $0x10] sm:$0xff]  ;;  %v340_v36 = vld [vmem:[%s653_s5] sm:$0xff]  ;;  %v341_v37 = vld [vmem:[%s653_s5 + $0x8] sm:$0xff]  ;;  %s477_s21 = scalar_lea.vmem %s393_s20, 16  ;;  %s481_s22 = scalar_lea.vmem %s393_s20, 32 }
  0x13   :  { %438 = vmatprep.subr.msk.bf16.mxu0 %vm411_vm3, %v501_v27  ;;  %v470_v38 = vld [vmem:[%s649_s1 + $0x18] sm:$0xff]   ;;  %v342_v39 = vld [vmem:[%s653_s5 + $0x10] sm:$0xff]  ;;  %v471_v41 = vld [vmem:[%s651_s3] sm:$0xff]   ;;  %p478_p0 = scmp.ne.s32.totalorder %s393_s20, %s477_s21  ;;  %p482_p1 = scmp.lt.s32.totalorder %s393_s20, %s393_s20 }
  0x14   :  { %252 = vperm.xlu0 %465, %v246_v30   ;;  %257 = vperm.xlu1 %466, %v247_v31   ;;  %v343_v40 = vld [vmem:[%s653_s5 + $0x18] sm:$0xff]  ;;  %v472_v14 = vld [vmem:[%s651_s3 + $0x8] sm:$0xff]   ;;  %p483_p2 = scmp.lt.s32.totalorder %s481_s22, %s477_s21 }
  0x15   :  { %456 = vmatprep.mubr.msk.bf16.mxu1 %vm280_vm4, %v471_v41 }
  0x16   :  { %439 = vmatpush3.bf16.msk.msra.mxu0 %vm411_vm3, %v501_v27  ;;  %p484_p3 = por %p483_p2, %p482_p1 }
  0x18   :  { %262 = vperm.xlu0 %465, %v248_v34   ;;  %267 = vperm.xlu1 %466, %v249_v35   ;;  %p485_p4 = pnand %p484_p3, %p478_p0 }
  0x19   :  { %441 = vmatmul.mubr.msk.bf16.vlgmr.msra.gmra.mxu0 %vm148_vm0, %v468_v32 }
  0x1a   :  { %444 = vmatprep.mubr.msk.bf16.mxu0 %vm148_vm0, %v469_v33 }
  0x1c   :  { %346 = vperm.xlu0 %465, %v340_v36   ;;  %351 = vperm.xlu1 %466, %v341_v37  }
  0x20   :  { %356 = vperm.xlu0 %465, %v342_v39   ;;  %361 = vperm.xlu1 %466, %v343_v40  }
  0x21   :  { %445 = vmatmul.mubr.msk.bf16.gmra.mxu0 %vm148_vm0, %v470_v38 }
  0x7d   :  { %v121_v44 = vpop.permute.xlu0 %120 }
  0x7f   :  { %v111_v42 = vpop.permute.xlu1 %110 }
  0x81   :  { %v126_v49 = vpop.permute.xlu0 %125 }
  0x83   :  { %v116_v47 = vpop.permute.xlu1 %115 }
  0x85   :  { %v101_v57 = vpop.permute.xlu0 %100 }
  0x87   :  { %v106_v53 = vpop.permute.xlu1 %105 }
  0x8b   :  { %v96_v3 = vpop.permute.xlu1 %95  ;;  %v91_v7 = vpop.permute.xlu0 %90 }
  0x8f   :  { %v253_v15 = vpop.permute.xlu0 %252  ;;  %v258_v16 = vpop.permute.xlu1 %257 }
  0x93   :  { %v263_v17 = vpop.permute.xlu0 %262  ;;  %v268_v19 = vpop.permute.xlu1 %267 }
  0x97   :  { %v347_v24 = vpop.permute.xlu0 %346  ;;  %v352_v29 = vpop.permute.xlu1 %351 }
  0x9b   :  { %v357_v35 = vpop.permute.xlu0 %356  ;;  %v362_v38 = vpop.permute.xlu1 %361 }
  0xd9   :  { %v442_v43 = vpop.f32.mrf.mxu0 }
  0xda   :  { %v208_v63 = vadd.f32 %v442_v43, %v101_v57 }
  0xdb   :  { %v199_v45 = vpop.f32.mrf.mxu0 }
  0xdc   :  { %v232_v8 = vmax.f32 %v208_v63, 0.0  ;;  %v200_v9 = vadd.f32 %v199_v45, %v91_v7 }
  0xdd   :  { %v443_v46 = vpop.f32.mrf.mxu0 }
  0xde   :  { %v211_v59 = vadd.f32 %v443_v46, %v106_v53  ;;  %v230_v12 = vmax.f32 %v200_v9, 0.0 }
  0xdf   :  { %v202_v48 = vpop.f32.mrf.mxu0 }
  0xe0   :  { %v233_v4 = vmax.f32 %v211_v59, 0.0  ;;  %v203_v5 = vadd.f32 %v202_v48, %v96_v3 }
  0xe1   :  { %v446_v50 = vpop.f32.mrf.mxu0 }
  0xe2   :  { %v224_v52 = vadd.f32 %v446_v50, %v121_v44  ;;  %v243_v10 = vpack.c.bf16 %v233_v4, %v232_v8  ;;  %v231_v11 = vmax.f32 %v203_v5, 0.0 }
  0xe3   :  { %v215_v51 = vpop.f32.mrf.mxu0 }
  0xe4   :  { %v216_v55 = vadd.f32 %v215_v51, %v111_v42  ;;  %v236_v60 = vmax.f32 %v224_v52, 0.0  ;;  %v242_v13 = vpack.c.bf16 %v231_v11, %v230_v12 }
  0xe5   :  { %v447_v54 = vpop.f32.mrf.mxu0 }
  0xe6   :  { %v227_v56 = vadd.f32 %v447_v54, %v126_v49  ;;  %v234_v0 = vmax.f32 %v216_v55, 0.0 }
  0xe7   :  { %v218_v58 = vpop.f32.mrf.mxu0 }
  0xe8   :  { %v237_v61 = vmax.f32 %v227_v56, 0.0  ;;  %v219_v62 = vadd.f32 %v218_v58, %v116_v47  ;;  %v378_v47 = vstv %s654_s6 }
  0xea   :  { %v235_v1 = vmax.f32 %v219_v62, 0.0  ;;  %v245_v2 = vpack.c.bf16 %v237_v61, %v236_v60 }
  0xec   :  { %v244_v6 = vpack.c.bf16 %v235_v1, %v234_v0  ;;  %448 = vmatprep.subr.bf16.mxu1 %v245_v2 }
  0xed   :  { %449 = vmatpush3.bf16.msra.mxu1 %v245_v2 }
  0xee   :  { %450 = vmatprep.subr.bf16.mxu1 %v244_v6 }
  0xf1   :  { %451 = vmatpush3.bf16.msra.mxu1 %v244_v6 }
  0xf2   :  { %452 = vmatprep.subr.bf16.mxu1 %v243_v10 }
  0xf5   :  { %453 = vmatpush3.bf16.msra.mxu1 %v243_v10 }
  0xf6   :  { %454 = vmatprep.subr.bf16.mxu1 %v242_v13 }
  0xf9   :  { %455 = vmatpush3.bf16.msra.mxu1 %v242_v13 }
  0xfc   :  { %457 = vmatmul.mubr.msk.bf16.vlgmr.msra.gmra.mxu1 %vm280_vm4, %v472_v14 }
 0x1bc   :  { %v458_v18 = vpop.f32.mrf.mxu1 }
 0x1bd   :  { %v330_v23 = vadd.f32 %v458_v18, %v263_v17 }
 0x1be   :  { %v321_v20 = vpop.f32.mrf.mxu1 }
 0x1bf   :  { %v322_v21 = vadd.f32 %v321_v20, %v253_v15  ;;  %v338_v30 = vmax.f32 %v330_v23, 0.0 }
 0x1c0   :  { %v459_v22 = vpop.f32.mrf.mxu1 }
 0x1c1   :  { %v336_v26 = vmax.f32 %v322_v21, 0.0  ;;  %v333_v27 = vadd.f32 %v459_v22, %v268_v19  ;;  %v366_v36 = vmul.f32 %v357_v35, %v338_v30 }
 0x1c2   :  { %v324_v25 = vpop.f32.mrf.mxu1 }
 0x1c3   :  { %v325_v28 = vadd.f32 %v324_v25, %v258_v16  ;;  %v364_v32 = vmul.f32 %v347_v24, %v336_v26  ;;  %v339_v33 = vmax.f32 %v333_v27, 0.0 }
 0x1c5   :  { %v337_v31 = vmax.f32 %v325_v28, 0.0  ;;  %v367_v39 = vmul.f32 %v362_v38, %v339_v33 }
 0x1c7   :  { %v365_v34 = vmul.f32 %v352_v29, %v337_v31 }
 0x1c9   :  { %v368_v37 = vadd.f32 %v365_v34, %v364_v32 }
 0x1cb   :  { %v369_v40 = vadd.f32 %v368_v37, %v366_v36 }
 0x1cd   :  { %v370_v41 = vadd.f32 %v369_v40, %v367_v39 }
 0x1cf   :  { %v371_v42 = vrot.slane %v370_v41, 4 }
 0x1d1   :  { %v372_v43 = vadd.f32 %v371_v42, %v370_v41 }
 0x1d3   :  { %v373_v44 = vrot.slane %v372_v43, 2 }
 0x1d5   :  { %v374_v45 = vadd.f32 %v373_v44, %v372_v43 }
 0x1d7   :  { %v375_v46 = vrot.slane %v374_v45, 1 }
 0x1d9   :  { %v376_v48 = vadd.f32 %v375_v46, %v374_v45 }
 0x1db   :  { %v379_v49 = vadd.f32 %v378_v47, %v376_v48 }
 0x1dd   :  { %v380_v50 = vsub.f32 0.0, %v379_v49 }
 0x1df   :  { %v381_v51 = vmul.f32 1.442695, %v380_v50 }
 0x1e1   :  { %473 = vpow2.f32 %v381_v51 }
 0x1ee   :  { %v474_v52 = vpop.eup %473 }
 0x1ef   :  { %v383_v53 = vadd.f32 1.0, %v474_v52 }
 0x1f1   :  { %475 = vrcp.f32 %v383_v53 }
 0x1fe   :  { %v476_v54 = vpop.eup %475 }
 0x1ff   :  { %385 = vst [vmem:[#allocation3] sm:$0x1] %v476_v54 }
 0x200   :  { %488 = shalt.err (!%p485_p4)
}
 0x201   :  { %395 = dma.vmem_to_hbm [thread:$0]  %s393_s20, 16, %s655_s7, [#allocation4]  }
 0x202   :  { %497 = dma.done.wait [#allocation4], 16  }
 0x203   :  { %498 = vsyncadd [#allocation4], 4294967280 }
 0x204   :  { %399 = vsyncpa [#allocation4], 1 }

</bundles_post_ra>
